<compile_context>
chip_gen: v6e
topology: v6e:2x2x1
jax: 0.10.0
libtpu: 0.0.40
codegen_flags: <defaults>
</compile_context>

<pallas_src>
import functools

import jax
import jax.numpy as jnp
import numpy as np
from jax.experimental import pallas as pl
from jax.experimental.pallas import tpu as pltpu

_LANES = 128


def _dice_kernel_roi(x_ref, t_ref, r_ref, inter_ref, union_ref,
                     inter_acc, union_acc, *, rows_total, block_rows, ragged):
    """Per-image masked dice partial sums over (block_rows, 128) tiles."""
    c = pl.program_id(1)

    @pl.when(c == 0)
    def _():
        inter_acc[...] = jnp.zeros_like(inter_acc)
        union_acc[...] = jnp.zeros_like(union_acc)

    x = jax.nn.sigmoid(x_ref[...].astype(jnp.float32))   # EUP exp + recip
    t = t_ref[...].astype(jnp.float32)
    r = r_ref[...].astype(jnp.float32)

    inter_v = x * t * r
    union_v = (x + t) * r

    if ragged:
        # Last row-block of each image may read past the image; mask it out.
        rows_idx = jax.lax.broadcasted_iota(jnp.int32, x_ref.shape, 0) + c * block_rows
        valid = rows_idx < rows_total
        inter_v = jnp.where(valid, inter_v, 0.0)
        union_v = jnp.where(valid, union_v, 0.0)

    # Lane-wide accumulation; the 128->1 reduce is done once in the wrapper.
    inter_acc[...] += jnp.sum(inter_v, axis=0, keepdims=True)
    union_acc[...] += jnp.sum(union_v, axis=0, keepdims=True)

    @pl.when(c == pl.num_programs(1) - 1)
    def _():
        inter_ref[...] = inter_acc[...]
        union_ref[...] = union_acc[...]


def _dice_kernel_noroi(x_ref, t_ref, inter_ref, union_ref,
                       inter_acc, union_acc, *, rows_total, block_rows, ragged):
    """roi=None variant: no third HBM stream is read at all."""
    c = pl.program_id(1)

    @pl.when(c == 0)
    def _():
        inter_acc[...] = jnp.zeros_like(inter_acc)
        union_acc[...] = jnp.zeros_like(union_acc)

    x = jax.nn.sigmoid(x_ref[...].astype(jnp.float32))
    t = t_ref[...].astype(jnp.float32)

    inter_v = x * t
    union_v = x + t

    if ragged:
        rows_idx = jax.lax.broadcasted_iota(jnp.int32, x_ref.shape, 0) + c * block_rows
        valid = rows_idx < rows_total
        inter_v = jnp.where(valid, inter_v, 0.0)
        union_v = jnp.where(valid, union_v, 0.0)

    inter_acc[...] += jnp.sum(inter_v, axis=0, keepdims=True)
    union_acc[...] += jnp.sum(union_v, axis=0, keepdims=True)

    @pl.when(c == pl.num_programs(1) - 1)
    def _():
        inter_ref[...] = inter_acc[...]
        union_ref[...] = union_acc[...]


def _dice_partial_sums(arrs, *, rows_total, block_rows, num_chunks, ragged):
    """arrs: 2 or 3 arrays of shape (N, rows_total, 128) in native dtypes.

    Returns per-image (intersect, union) f32 vectors of shape (N,).
    """
    n = arrs[0].shape[0]
    use_roi = len(arrs) == 3
    kern = _dice_kernel_roi if use_roi else _dice_kernel_noroi
    kernel = functools.partial(kern, rows_total=rows_total,
                               block_rows=block_rows, ragged=ragged)

    in_specs = [pl.BlockSpec((None, block_rows, _LANES), lambda i, c: (i, c, 0))
                for _ in arrs]
    out_specs = [pl.BlockSpec((None, 1, _LANES), lambda i, c: (i, 0, 0))
                 for _ in range(2)]

    total_elems = n * rows_total * _LANES
    bytes_accessed = int(sum(a.size * a.dtype.itemsize for a in arrs)
                         + 2 * n * _LANES * 4)

    inter, union = pl.pallas_call(
        kernel,
        out_shape=(jax.ShapeDtypeStruct((n, 1, _LANES), jnp.float32),
                   jax.ShapeDtypeStruct((n, 1, _LANES), jnp.float32)),
        grid_spec=pltpu.PrefetchScalarGridSpec(
            num_scalar_prefetch=0,
            grid=(n, num_chunks),
            in_specs=in_specs,
            out_specs=out_specs,
            scratch_shapes=[pltpu.VMEM((1, _LANES), jnp.float32),
                            pltpu.VMEM((1, _LANES), jnp.float32)]),
        compiler_params=pltpu.CompilerParams(
            dimension_semantics=("parallel", "arbitrary"),
            vmem_limit_bytes=40 * 1024 * 1024),
        cost_estimate=pl.CostEstimate(
            flops=7 * total_elems,
            transcendentals=total_elems,
            bytes_accessed=bytes_accessed),
    )(*arrs)

    # Tiny (N,128) lane-wide partials -> per-image scalars.
    return jnp.sum(inter[:, 0, :], axis=-1), jnp.sum(union[:, 0, :], axis=-1)


@functools.partial(jax.jit,
                   static_argnames=("smooth", "eps", "per_img", "block_rows"))
def masked_soft_dice_loss(x, target, roi=None, *, smooth=1.0, eps=1e-12,
                          per_img=False, block_rows=4096):
    n = x.shape[0]

    def flat(a):
        a = a.reshape(n, -1)
        if a.dtype == jnp.bool_:
            a = a.astype(jnp.bfloat16)   # keep mask streams narrow (no f32 upcast)
        return a

    xf = flat(x)
    tf = flat(target)
    rf = None if roi is None else flat(roi)
    f = xf.shape[1]

    pad = (-f) % _LANES
    if pad:
        # Rare fallback (F not a multiple of 128): one small pad-to-128 copy.
        # Logits padded with a large negative => sigmoid == 0, so the padded
        # tail contributes exactly 0 to both sums even without an roi.
        xf = jnp.pad(xf, ((0, 0), (0, pad)), constant_values=-1e9)
        tf = jnp.pad(tf, ((0, 0), (0, pad)))
        if rf is not None:
            rf = jnp.pad(rf, ((0, 0), (0, pad)))
    fp = f + pad
    rows = fp // _LANES

    br = min(int(block_rows), rows)
    if br < rows:
        br = max(8, (br // 8) * 8)   # sublane-aligned tiles when not full-extent
        br = min(br, rows)
    num_chunks = -(-rows // br)
    ragged = (rows % br) != 0

    arrs = [xf.reshape(n, rows, _LANES), tf.reshape(n, rows, _LANES)]
    if rf is not None:
        arrs.append(rf.reshape(n, rows, _LANES))

    intersect, union = _dice_partial_sums(
        arrs, rows_total=rows, block_rows=br,
        num_chunks=num_chunks, ragged=ragged)

    if per_img:
        return jnp.mean(1.0 - (2.0 * intersect + smooth) / (union + eps + smooth))
    return 1.0 - (2.0 * jnp.sum(intersect) + smooth) / (jnp.sum(union) + eps + smooth)


def _reference(x, target, roi, smooth=1.0, eps=1e-12, per_img=False):
    n = x.shape[0]
    s = jax.nn.sigmoid(x.astype(jnp.float32)).reshape(n, -1)
    t = target.astype(jnp.float32).reshape(n, -1)
    r = roi.astype(jnp.float32).reshape(n, -1)
    intersect = jnp.sum(s * t * r, axis=1)
    union = jnp.sum((s + t) * r, axis=1)
    if per_img:
        return jnp.mean(1.0 - (2.0 * intersect + smooth) / (union + eps + smooth))
    return 1.0 - (2.0 * jnp.sum(intersect) + smooth) / (jnp.sum(union) + eps + smooth)


if __name__ == "__main__":
    key = jax.random.PRNGKey(0)
    k1, k2, k3 = jax.random.split(key, 3)

    N, C, H, W = 2, 4, 16, 16
    x = jax.random.normal(k1, (N, C, H, W), dtype=jnp.float32)            # logits
    target = (jax.random.uniform(k2, (N, C, H, W)) > 0.5).astype(jnp.float32)
    roi = (jax.random.uniform(k3, (N, C, H, W)) > 0.3).astype(jnp.float32)

    # f32 inputs, roi / per_img / no-roi paths
    loss_batch = jax.block_until_ready(masked_soft_dice_loss(x, target, roi))
    loss_perim = jax.block_until_ready(
        masked_soft_dice_loss(x, target, roi, per_img=True))
    loss_noroi = jax.block_until_ready(masked_soft_dice_loss(x, target))

    ref_batch = _reference(x, target, roi)
    ref_perim = _reference(x, target, roi, per_img=True)
    ref_noroi = _reference(x, target, jnp.ones_like(x))

    assert np.allclose(np.asarray(loss_batch), np.asarray(ref_batch), rtol=1e-4, atol=1e-5)
    assert np.allclose(np.asarray(loss_perim), np.asarray(ref_perim), rtol=1e-4, atol=1e-5)
    assert np.allclose(np.asarray(loss_noroi), np.asarray(ref_noroi), rtol=1e-4, atol=1e-5)

    # native bf16 streams (no wrapper upcast)
    xb, tb, rb = (a.astype(jnp.bfloat16) for a in (x, target, roi))
    loss_bf16 = jax.block_until_ready(masked_soft_dice_loss(xb, tb, rb))
    ref_bf16 = _reference(xb.astype(jnp.float32), tb.astype(jnp.float32),
                          rb.astype(jnp.float32))
    assert np.allclose(np.asarray(loss_bf16), np.asarray(ref_bf16), rtol=1e-3, atol=1e-4)

    # ragged row-block path (rows % block_rows != 0 -> in-kernel masking)
    x2 = jax.random.normal(k1, (2, 3, 32, 32), dtype=jnp.float32)   # F=3072 -> 24 rows
    t2 = (jax.random.uniform(k2, (2, 3, 32, 32)) > 0.5).astype(jnp.float32)
    r2 = (jax.random.uniform(k3, (2, 3, 32, 32)) > 0.3).astype(jnp.float32)
    loss_rag = jax.block_until_ready(
        masked_soft_dice_loss(x2, t2, r2, block_rows=16))
    ref_rag = _reference(x2, t2, r2)
    assert np.allclose(np.asarray(loss_rag), np.asarray(ref_rag), rtol=1e-4, atol=1e-5)

    # fallback path: F not a multiple of 128, roi=None (pad-to-128 inside wrapper)
    x3 = jax.random.normal(k1, (2, 3, 10, 10), dtype=jnp.float32)   # F=300
    t3 = (jax.random.uniform(k2, (2, 3, 10, 10)) > 0.5).astype(jnp.float32)
    loss_pad = jax.block_until_ready(masked_soft_dice_loss(x3, t3))
    ref_pad = _reference(x3, t3, jnp.ones_like(x3))
    assert np.allclose(np.asarray(loss_pad), np.asarray(ref_pad), rtol=1e-4, atol=1e-5)

    print("KERNEL_OK")
</pallas_src>

<mosaic_0001>
module attributes {stable_mosaic.version = 11 : i64} {
  func.func @_dice_kernel_roi(%arg0: i32, %arg1: i32, %arg2: memref<1x8x128xf32, #tpu.memory_space<vmem>>, %arg3: memref<1x8x128xf32, #tpu.memory_space<vmem>>, %arg4: memref<1x8x128xf32, #tpu.memory_space<vmem>>, %arg5: memref<1x1x128xf32, #tpu.memory_space<vmem>>, %arg6: memref<1x1x128xf32, #tpu.memory_space<vmem>>, %arg7: memref<1x128xf32, #tpu.memory_space<vmem>>, %arg8: memref<1x128xf32, #tpu.memory_space<vmem>>) attributes {dimension_semantics = [#tpu.dimension_semantics<parallel>, #tpu.dimension_semantics<arbitrary>], iteration_bounds = array<i64: 2, 1>, scalar_prefetch = 0 : i64, scratch_operands = 2 : i64, tpu.core_type = #tpu.core_type<tc>, window_params = [{transform_indices = @transform_0, window_bounds = array<i64: 1, 8, 128>}, {transform_indices = @transform_1, window_bounds = array<i64: 1, 8, 128>}, {transform_indices = @transform_2, window_bounds = array<i64: 1, 8, 128>}, {transform_indices = @transform_3, window_bounds = array<i64: 1, 1, 128>}, {transform_indices = @transform_4, window_bounds = array<i64: 1, 1, 128>}]} {
    %c0_i32 = arith.constant 0 : i32
    %0 = arith.cmpi eq, %arg1, %c0_i32 : i32
    %1 = arith.extui %0 : i1 to i32
    %c0_i32_0 = arith.constant 0 : i32
    %2 = arith.cmpi ne, %1, %c0_i32_0 : i32
    scf.if %2 {
      %cst_21 = arith.constant 0.000000e+00 : f32
      %31 = vector.broadcast %cst_21 : f32 to vector<1x128xf32>
      %c0_22 = arith.constant 0 : index
      %c0_23 = arith.constant 0 : index
      %32 = vector.load %arg7[%c0_22, %c0_23] : memref<1x128xf32, #tpu.memory_space<vmem>>, vector<1x128xf32>
      tpu.vector_store %arg7[%c0_22, %c0_23], %31 {strides = array<i32>} : memref<1x128xf32, #tpu.memory_space<vmem>>, vector<1x128xf32>,
      %cst_24 = arith.constant 0.000000e+00 : f32
      %33 = vector.broadcast %cst_24 : f32 to vector<1x128xf32>
      %c0_25 = arith.constant 0 : index
      %c0_26 = arith.constant 0 : index
      %34 = vector.load %arg8[%c0_25, %c0_26] : memref<1x128xf32, #tpu.memory_space<vmem>>, vector<1x128xf32>
      tpu.vector_store %arg8[%c0_25, %c0_26], %33 {strides = array<i32>} : memref<1x128xf32, #tpu.memory_space<vmem>>, vector<1x128xf32>,
    } else {
    }
    %c0 = arith.constant 0 : index
    %c0_1 = arith.constant 0 : index
    %c0_2 = arith.constant 0 : index
    %3 = vector.load %arg2[%c0, %c0_1, %c0_2] : memref<1x8x128xf32, #tpu.memory_space<vmem>>, vector<1x8x128xf32>
    %4 = vector.shape_cast %3 : vector<1x8x128xf32> to vector<8x128xf32>
    %5 = arith.negf %4 : vector<8x128xf32>
    %6 = math.exp %5 : vector<8x128xf32>
    %cst = arith.constant 1.000000e+00 : f32
    %7 = vector.broadcast %cst : f32 to vector<8x128xf32>
    %8 = arith.addf %7, %6 : vector<8x128xf32>
    %9 = arith.divf %7, %8 : vector<8x128xf32>
    %c0_3 = arith.constant 0 : index
    %c0_4 = arith.constant 0 : index
    %c0_5 = arith.constant 0 : index
    %10 = vector.load %arg3[%c0_3, %c0_4, %c0_5] : memref<1x8x128xf32, #tpu.memory_space<vmem>>, vector<1x8x128xf32>
    %11 = vector.shape_cast %10 : vector<1x8x128xf32> to vector<8x128xf32>
    %c0_6 = arith.constant 0 : index
    %c0_7 = arith.constant 0 : index
    %c0_8 = arith.constant 0 : index
    %12 = vector.load %arg4[%c0_6, %c0_7, %c0_8] : memref<1x8x128xf32, #tpu.memory_space<vmem>>, vector<1x8x128xf32>
    %13 = vector.shape_cast %12 : vector<1x8x128xf32> to vector<8x128xf32>
    %14 = arith.mulf %9, %11 : vector<8x128xf32>
    %15 = arith.mulf %14, %13 : vector<8x128xf32>
    %16 = arith.addf %9, %11 : vector<8x128xf32>
    %17 = arith.mulf %16, %13 : vector<8x128xf32>
    %c0_9 = arith.constant 0 : index
    %c0_10 = arith.constant 0 : index
    %18 = vector.load %arg7[%c0_9, %c0_10] : memref<1x128xf32, #tpu.memory_space<vmem>>, vector<1x128xf32>
    %cst_11 = arith.constant dense<0.000000e+00> : vector<128xf32>
    %19 = vector.multi_reduction <add>, %15, %cst_11 [0] : vector<8x128xf32> to vector<128xf32>
    %20 = vector.shape_cast %19 : vector<128xf32> to vector<1x128xf32>
    %21 = arith.addf %18, %20 : vector<1x128xf32>
    %c0_12 = arith.constant 0 : index
    %c0_13 = arith.constant 0 : index
    %22 = vector.load %arg7[%c0_12, %c0_13] : memref<1x128xf32, #tpu.memory_space<vmem>>, vector<1x128xf32>
    tpu.vector_store %arg7[%c0_12, %c0_13], %21 {strides = array<i32>} : memref<1x128xf32, #tpu.memory_space<vmem>>, vector<1x128xf32>,
    %c0_14 = arith.constant 0 : index
    %c0_15 = arith.constant 0 : index
    %23 = vector.load %arg8[%c0_14, %c0_15] : memref<1x128xf32, #tpu.memory_space<vmem>>, vector<1x128xf32>
    %cst_16 = arith.constant dense<0.000000e+00> : vector<128xf32>
    %24 = vector.multi_reduction <add>, %17, %cst_16 [0] : vector<8x128xf32> to vector<128xf32>
    %25 = vector.shape_cast %24 : vector<128xf32> to vector<1x128xf32>
    %26 = arith.addf %23, %25 : vector<1x128xf32>
    %c0_17 = arith.constant 0 : index
    %c0_18 = arith.constant 0 : index
    %27 = vector.load %arg8[%c0_17, %c0_18] : memref<1x128xf32, #tpu.memory_space<vmem>>, vector<1x128xf32>
    tpu.vector_store %arg8[%c0_17, %c0_18], %26 {strides = array<i32>} : memref<1x128xf32, #tpu.memory_space<vmem>>, vector<1x128xf32>,
    %c0_i32_19 = arith.constant 0 : i32
    %28 = arith.cmpi eq, %arg1, %c0_i32_19 : i32
    %29 = arith.extui %28 : i1 to i32
    %c0_i32_20 = arith.constant 0 : i32
    %30 = arith.cmpi ne, %29, %c0_i32_20 : i32
    scf.if %30 {
      %c0_21 = arith.constant 0 : index
      %c0_22 = arith.constant 0 : index
      %31 = vector.load %arg7[%c0_21, %c0_22] : memref<1x128xf32, #tpu.memory_space<vmem>>, vector<1x128xf32>
      %c0_23 = arith.constant 0 : index
      %c0_24 = arith.constant 0 : index
      %c0_25 = arith.constant 0 : index
      %32 = vector.load %arg5[%c0_23, %c0_24, %c0_25] : memref<1x1x128xf32, #tpu.memory_space<vmem>>, vector<1x1x128xf32>
      %33 = vector.shape_cast %32 : vector<1x1x128xf32> to vector<1x128xf32>
      %34 = vector.shape_cast %31 : vector<1x128xf32> to vector<1x1x128xf32>
      tpu.vector_store %arg5[%c0_23, %c0_24, %c0_25], %34 {strides = array<i32>} : memref<1x1x128xf32, #tpu.memory_space<vmem>>, vector<1x1x128xf32>,
      %c0_26 = arith.constant 0 : index
      %c0_27 = arith.constant 0 : index
      %35 = vector.load %arg8[%c0_26, %c0_27] : memref<1x128xf32, #tpu.memory_space<vmem>>, vector<1x128xf32>
      %c0_28 = arith.constant 0 : index
      %c0_29 = arith.constant 0 : index
      %c0_30 = arith.constant 0 : index
      %36 = vector.load %arg6[%c0_28, %c0_29, %c0_30] : memref<1x1x128xf32, #tpu.memory_space<vmem>>, vector<1x1x128xf32>
      %37 = vector.shape_cast %36 : vector<1x1x128xf32> to vector<1x128xf32>
      %38 = vector.shape_cast %35 : vector<1x128xf32> to vector<1x1x128xf32>
      tpu.vector_store %arg6[%c0_28, %c0_29, %c0_30], %38 {strides = array<i32>} : memref<1x1x128xf32, #tpu.memory_space<vmem>>, vector<1x1x128xf32>,
    } else {
    }
    return
  }
  func.func @transform_0(%arg0: i32, %arg1: i32) -> (i32, i32, i32) {
    %c0_i32 = arith.constant 0 : i32
    %c0_i32_0 = arith.constant 0 : i32
    return %arg0, %arg1, %c0_i32 : i32, i32, i32
  }
  func.func @transform_1(%arg0: i32, %arg1: i32) -> (i32, i32, i32) {
    %c0_i32 = arith.constant 0 : i32
    %c0_i32_0 = arith.constant 0 : i32
    return %arg0, %arg1, %c0_i32 : i32, i32, i32
  }
  func.func @transform_2(%arg0: i32, %arg1: i32) -> (i32, i32, i32) {
    %c0_i32 = arith.constant 0 : i32
    %c0_i32_0 = arith.constant 0 : i32
    return %arg0, %arg1, %c0_i32 : i32, i32, i32
  }
  func.func @transform_3(%arg0: i32, %arg1: i32) -> (i32, i32, i32) {
    %c0_i32 = arith.constant 0 : i32
    %c0_i32_0 = arith.constant 0 : i32
    %c0_i32_1 = arith.constant 0 : i32
    return %arg0, %c0_i32, %c0_i32_0 : i32, i32, i32
  }
  func.func @transform_4(%arg0: i32, %arg1: i32) -> (i32, i32, i32) {
    %c0_i32 = arith.constant 0 : i32
    %c0_i32_0 = arith.constant 0 : i32
    %c0_i32_1 = arith.constant 0 : i32
    return %arg0, %c0_i32, %c0_i32_0 : i32, i32, i32
  }
}

</mosaic_0001>

<bundles_post_ra>
// kernel: masked_soft_dice_loss.1
= control target key start
LH: loop header
LB: loop body
LE: loop exit
PB: predicated region body
PF: predicated region fallthrough
CT: control target
= control target key end

     0   :  { %s526_s15 = smov 0   ;;  %s528_s16 = smov 0   ;;  %s573_s0 = inlined_call_operand.vmem [shape: f32[2,8,128], index: 0, kind: input, shape index: {}]   ;;  %s574_s1 = inlined_call_operand.vmem [shape: f32[2,8,128], index: 1, kind: input, shape index: {}]   ;;  %s575_s2 = inlined_call_operand.vmem [shape: f32[2,8,128], index: 2, kind: input, shape index: {}]   ;;  %s576_s3 = inlined_call_operand.vmem [shape: f32[2,1,128], index: 3, kind: output, shape index: {0}]   ;;  %s577_s4 = inlined_call_operand.vmem [shape: f32[2,1,128], index: 4, kind: output, shape index: {1}]  }
   0x1   :  { %s530_s17 = smov 0  }
   0x2 LB: > { %s27_s18 = sadd.s32 1, %s494_s16  ;;  %p440_p0 = scmp.ge.s32.totalorder %s498_s17, 1  ;;  %s498_s17 = sphi %s530_s17, %s15_s17   ;;  %s494_s16 = sphi %s528_s16, %s579_s16   ;;  %s490_s15 = sphi %s526_s15, %s578_s15  }
   0x3   : > { %p29_p1 = scmp.ge.s32.totalorder %s27_s18, 2  ;;  %p209_p2 = scmp.lt.s32.totalorder %s498_s17, 3 }
   0x5   : > { %s581_s18 = smov (%p29_p1, %s27_s18), 0  ;;  %p210_p3 = pnand %p440_p0, %p209_p2 }
   0x6   : > { %p252_p4 = scmp.lt.s32.totalorder (!%p210_p3), %s490_s15, 1 }
   0x7   : > { %213 = sbr.rel (%p210_p3) target bundleno = 75 (0x4b), region = 32 }
   0xc   : > { %v500_v0 = vmov 0.0   ;;  %s583_s15 = smov (!%p252_p4, %s490_s15), 1 }
   0xd   : > { %283 = vst [vmem:[#allocation2] sm:$0x1] %v500_v0  ;;  %284 = vst [vmem:[#allocation3] sm:$0x1] %v500_v0  ;;  %s441_s19 = sshll.u32 %s583_s15, 3  ;;  %s275_s5 = scalar_lea.vmem %s576_s3, %s583_s15 }
   0xe   : > { %s258_s22 = scalar_lea.vmem %s573_s0, %s441_s19  ;;  %s265_s25 = scalar_lea.vmem %s574_s1, %s441_s19 }
   0xf   : > { %v285_v1 = vld [vmem:[%s258_s22] sm:$0xff]  ;;  %s272_s28 = scalar_lea.vmem %s575_s2, %s441_s19  ;;  %s278_s8 = scalar_lea.vmem %s577_s4, %s583_s15 }
  0x10   : > { %v444_v2 = vmul.f32 -1.442695, %v285_v1  ;;  %v292_v5 = vld [vmem:[%s265_s25] sm:$0xff] }
  0x11   : > { %v293_v7 = vld [vmem:[%s272_s28] sm:$0xff] }
  0x12   : > { %472 = vpow2.f32 %v444_v2 }
  0x14   : > { %v298_v22 = vld [vmem:[#allocation2] sm:$0x1]  ;;  %v307_v23 = vld [vmem:[#allocation3] sm:$0x1] }
  0x1f   : > { %v473_v3 = vpop.eup %472 }
  0x20   : > { %v289_v4 = vadd.f32 1.0, %v473_v3 }
  0x22   : > { %474 = vrcp.f32 %v289_v4 }
  0x2f   : > { %v475_v6 = vpop.eup %474 }
  0x30   : > { %v294_v8 = vmul.f32 %v475_v6, %v292_v5  ;;  %v296_v9 = vadd.f32 %v475_v6, %v292_v5 }
  0x32   : > { %v295_v10 = vmul.f32 %v294_v8, %v293_v7  ;;  %v297_v11 = vmul.f32 %v296_v9, %v293_v7 }
  0x34   : > { %v299_v12 = vrot.slane %v295_v10, 4  ;;  %v308_v13 = vrot.slane %v297_v11, 4 }
  0x36   : > { %v300_v14 = vadd.f32 %v299_v12, %v295_v10  ;;  %v309_v15 = vadd.f32 %v308_v13, %v297_v11 }
  0x38   : > { %v301_v16 = vrot.slane %v300_v14, 2  ;;  %v310_v17 = vrot.slane %v309_v15, 2 }
  0x3a   : > { %v302_v18 = vadd.f32 %v301_v16, %v300_v14  ;;  %v311_v19 = vadd.f32 %v310_v17, %v309_v15 }
  0x3c   : > { %v303_v20 = vrot.slane %v302_v18, 1  ;;  %v312_v21 = vrot.slane %v311_v19, 1 }
  0x3e   : > { %v304_v24 = vadd.f32 %v303_v20, %v302_v18  ;;  %v313_v25 = vadd.f32 %v312_v21, %v311_v19 }
  0x40   : > { %v305_v26 = vadd.f32 %v304_v24, %v298_v22  ;;  %v314_v27 = vadd.f32 %v313_v25, %v307_v23 }
  0x42   : > { %306 = vst [vmem:[#allocation2] sm:$0x1] %v305_v26  ;;  %315 = vst [vmem:[#allocation3] sm:$0x1] %v314_v27 }
  0x49   : > { %v319_v28 = vld [vmem:[#allocation2] sm:$0x1]  ;;  %v321_v29 = vld [vmem:[#allocation3] sm:$0x1] }
  0x4a   : > { %320 = vst [vmem:[%s275_s5] sm:$0x1] %v319_v28  ;;  %322 = vst [vmem:[%s278_s8] sm:$0x1] %v321_v29 }
  0x4b PF: > { %s15_s17 = sadd.s32 1, %s498_s17   ;;  %s578_s15 = smov %s494_s16 }
  0x4c   : > { %p12_p5 = scmp.ge.s32.totalorder %s15_s17, 4   ;;  %s579_s16 = smov %s581_s18 }
  0x4e   :  { %14 = sbr.rel (!%p12_p5) target bundleno = 2 (0x2), region = 88 }

</bundles_post_ra>
